<compile_context>
chip_gen: v7x
topology: tpu7x:2x2x1
jax: 0.10.0
libtpu: 0.0.40
codegen_flags: <defaults>
</compile_context>

<pallas_src>
import jax
import jax.numpy as jnp
from jax.experimental import pallas as pl
from jax.experimental.pallas import tpu as pltpu


# ---------------------------------------------------------------------------
# Kernel
# ---------------------------------------------------------------------------
def _react_kernel(c_ref, x_ref, o_ref):
    # y = min(x, c); c lives in SMEM as an f32 scalar. Single VPU min per vreg.
    o_ref[...] = jnp.minimum(x_ref[...], c_ref[0].astype(x_ref.dtype))


def _react_2d(x2d, c_arr, block_shape, grid_len, iter_axis, alias_input):
    """One pallas_call over a 2-D slab, iterating blocks along `iter_axis`."""
    rows, cols = x2d.shape
    if iter_axis == 0:
        idx_map = lambda i: (i, 0)     # iterate row-blocks (aligned path)
    else:
        idx_map = lambda i: (0, i)     # iterate lane-blocks (ragged path)
    return pl.pallas_call(
        _react_kernel,
        out_shape=jax.ShapeDtypeStruct((rows, cols), x2d.dtype),
        grid=(grid_len,),
        in_specs=[
            pl.BlockSpec(memory_space=pltpu.MemorySpace.SMEM),  # c (f32 scalar)
            pl.BlockSpec(block_shape, idx_map),                 # x tile
        ],
        out_specs=pl.BlockSpec(block_shape, idx_map),
        compiler_params=pltpu.CompilerParams(
            dimension_semantics=("parallel",),
        ),
        input_output_aliases=({1: 0} if alias_input else {}),
    )(c_arr, x2d)


# ---------------------------------------------------------------------------
# Generation-keyed tuning
# ---------------------------------------------------------------------------
_SINGLE_BLOCK_BYTES = 2 * 1024 * 1024            # small inputs: one block
_TARGET_BLOCK_BYTES = {                          # tiled path, per generation
    "v7x": 4 * 1024 * 1024,   # 3.2 TB/s: 2 MiB blocks make the ~0.35us step tax big
    "v6e": 4 * 1024 * 1024,   # measured ~86% vs ~85% of roofline; free win
    "v5e": 2 * 1024 * 1024,   # 4 MiB x 4 buffers would blow the 16 MiB scoped limit
}
# Ragged (n % 128 != 0) path: (1, n) view, sublane dim is 1 so each block pads
# to a full sublane tile in VMEM (8x/16x/32x). 64K elements keeps the padded,
# double-buffered footprint <= 8 MiB for f32/bf16/int8 on every generation.
_RAGGED_SINGLE_BLOCK_ELEMS = 64 * 1024
_RAGGED_LANE_BLOCK_ELEMS = 64 * 1024


def _tpu_generation():
    try:
        kind = jax.devices()[0].device_kind.lower()
    except Exception:
        return "unknown"
    if "v7" in kind or "7x" in kind:
        return "v7x"
    if "v6" in kind:
        return "v6e"
    if "v5" in kind and ("lite" in kind or "5e" in kind):
        return "v5e"
    return "unknown"


# ---------------------------------------------------------------------------
# Wrapper (jitted; all tiling decisions are static per input shape/dtype)
# ---------------------------------------------------------------------------
def _react_impl(x, c=1.0, inplace=False):
    orig_shape = x.shape
    dtype = x.dtype
    n = x.size
    if n == 0:
        return x

    itemsize = jnp.dtype(dtype).itemsize
    sub = {4: 8, 2: 16, 1: 32}.get(itemsize, 8)   # min sublane multiple per dtype
    nbytes = n * itemsize

    gen = _tpu_generation()
    target_block_bytes = _TARGET_BLOCK_BYTES.get(gen, 2 * 1024 * 1024)
    num_tc = 2 if gen == "v7x" else 1             # only v7x has 2 TCs per chip

    c_arr = jnp.full((1,), c, dtype=jnp.float32)
    flat = x.reshape(-1)    # bitcast under jit for row-major inputs

    # ---- ragged path: numel not a multiple of 128 (rare) -- zero copies ----
    if n % 128 != 0:
        x2d = flat.reshape(1, n)
        if n <= _RAGGED_SINGLE_BLOCK_ELEMS:
            # One full-array block (block shape == array dims).
            out2d = _react_2d(x2d, c_arr, (1, n), 1, 1, inplace)
        else:
            # Lane-dense (1, 64K) blocks along the lane axis; Pallas masks the
            # partial last block. No pad/concat/slice copies.
            blk = _RAGGED_LANE_BLOCK_ELEMS
            out2d = _react_2d(x2d, c_arr, (1, blk), pl.cdiv(n, blk), 1, inplace)
        return out2d.reshape(orig_shape)

    # ---- aligned path: lane-dense (rows, W) slab, W up to 4096 ----
    W = next(w for w in (4096, 2048, 1024, 512, 256, 128) if n % w == 0)
    rows = n // W
    x2d = flat.reshape(rows, W)

    if nbytes <= _SINGLE_BLOCK_BYTES or rows < sub:
        # Single full-array block, grid of 1: zero per-step overhead.
        out2d = _react_2d(x2d, c_arr, (rows, W), 1, 0, inplace)
    else:
        target_rows = max(sub, (target_block_bytes // (W * itemsize)) // sub * sub)
        block_rows = min(target_rows, (rows // sub) * sub)
        if num_tc > 1:
            # Only on multi-TC parts (v7x): keep >= 4 steps per TensorCore so
            # the "parallel" grid axis can be sharded across both cores.
            min_steps = 4 * num_tc
            if rows // block_rows < min_steps and (rows // min_steps) >= sub:
                block_rows = ((rows // min_steps) // sub) * sub
        grid_len = pl.cdiv(rows, block_rows)   # partial last block masked by Pallas
        out2d = _react_2d(x2d, c_arr, (block_rows, W), grid_len, 0, inplace)

    return out2d.reshape(orig_shape)


# jit so host-side reshapes become bitcasts and `c` stays a traced scalar
# (no recompile when c changes).  `inplace` is a static flag.
react = jax.jit(_react_impl, static_argnames=("inplace",))


# ---------------------------------------------------------------------------
# Self-test
# ---------------------------------------------------------------------------
if __name__ == "__main__":
    key = jax.random.PRNGKey(0)
    k0, k1, k2, k3 = jax.random.split(key, 4)
    c = 1.0

    # NCHW input like the PyTorch module receives (aligned, single-block path).
    x_small = jax.random.normal(k0, (2, 4, 16, 16), dtype=jnp.float32) * 2.0
    y_small = jax.block_until_ready(react(x_small, c))
    assert y_small.shape == x_small.shape and y_small.dtype == x_small.dtype
    assert jnp.allclose(y_small, jnp.minimum(x_small, c)), "small aligned path mismatch"

    # Larger input: exercises the tiled, pipelined, generation-sized block path.
    x_big = jax.random.normal(k1, (8, 32, 64, 64), dtype=jnp.float32) * 2.0
    y_big = jax.block_until_ready(react(x_big, c))
    assert jnp.allclose(y_big, jnp.minimum(x_big, c)), "tiled aligned path mismatch"

    # Ragged (numel % 128 != 0), small: single (1, n) block, no padding copies.
    x_rag_s = jax.random.normal(k2, (2, 3, 5, 7), dtype=jnp.float32) * 2.0
    y_rag_s = jax.block_until_ready(react(x_rag_s, c))
    assert jnp.allclose(y_rag_s, jnp.minimum(x_rag_s, c)), "small ragged path mismatch"

    # Ragged, larger than the single-block threshold: lane-blocked (1, n) grid
    # with a masked partial last block (the zero-copy replacement for pad+slice).
    x_rag_b = jax.random.normal(k3, (3, 13, 1721), dtype=jnp.float32) * 2.0
    y_rag_b = jax.block_until_ready(react(x_rag_b, c))
    assert y_rag_b.shape == x_rag_b.shape and y_rag_b.dtype == x_rag_b.dtype
    assert jnp.allclose(y_rag_b, jnp.minimum(x_rag_b, c)), "large ragged path mismatch"

    print("KERNEL_OK")
</pallas_src>

<mosaic_0001>
module attributes {stable_mosaic.version = 11 : i64} {
  func.func @_react_kernel(%arg0: i32, %arg1: memref<1xf32, #tpu.memory_space<smem>>, %arg2: memref<1x2048xf32, #tpu.memory_space<vmem>>, %arg3: memref<1x2048xf32, #tpu.memory_space<vmem>>) attributes {dimension_semantics = [#tpu.dimension_semantics<parallel>], iteration_bounds = array<i64: 1>, scalar_prefetch = 0 : i64, scratch_operands = 0 : i64, tpu.core_type = #tpu.core_type<tc>, window_params = [{transform_indices = @transform_0, window_bounds = array<i64: 1>}, {transform_indices = @transform_1, window_bounds = array<i64: 1, 2048>}, {transform_indices = @transform_2, window_bounds = array<i64: 1, 2048>}]} {
    %c0 = arith.constant 0 : index
    %c0_0 = arith.constant 0 : index
    %0 = vector.load %arg2[%c0, %c0_0] : memref<1x2048xf32, #tpu.memory_space<vmem>>, vector<1x2048xf32>
    %c0_1 = arith.constant 0 : index
    %1 = memref.load %arg1[%c0_1] : memref<1xf32, #tpu.memory_space<smem>>
    %2 = vector.broadcast %1 : f32 to vector<1x2048xf32>
    %3 = arith.minimumf %0, %2 : vector<1x2048xf32>
    %c0_2 = arith.constant 0 : index
    %c0_3 = arith.constant 0 : index
    %4 = vector.load %arg3[%c0_2, %c0_3] : memref<1x2048xf32, #tpu.memory_space<vmem>>, vector<1x2048xf32>
    tpu.vector_store %arg3[%c0_2, %c0_3], %3 {strides = array<i32>} : memref<1x2048xf32, #tpu.memory_space<vmem>>, vector<1x2048xf32>,
    return
  }
  func.func @transform_0(%arg0: i32) -> i32 {
    %c0_i32 = arith.constant 0 : i32
    %c0_i32_0 = arith.constant 0 : i32
    return %c0_i32 : i32
  }
  func.func @transform_1(%arg0: i32) -> (i32, i32) {
    %c0_i32 = arith.constant 0 : i32
    %c0_i32_0 = arith.constant 0 : i32
    return %arg0, %c0_i32 : i32, i32
  }
  func.func @transform_2(%arg0: i32) -> (i32, i32) {
    %c0_i32 = arith.constant 0 : i32
    %c0_i32_0 = arith.constant 0 : i32
    return %arg0, %c0_i32 : i32, i32
  }
}

</mosaic_0001>

<bundles_post_ra>
// kernel: _react_impl.1
= control target key start
LH: loop header
LB: loop body
LE: loop exit
PB: predicated region body
PF: predicated region fallthrough
CT: control target
= control target key end

     0   :  { %s54_s0 = inlined_call_operand.<no memory space> [shape: f32[1], index: 0, kind: input, shape index: {}]   ;;  %s55_s1 = inlined_call_operand.vmem [shape: f32[1,2048], index: 1, kind: input, shape index: {}]   ;;  %s56_s2 = inlined_call_operand.vmem [shape: f32[1,2048], index: 2, kind: output, shape index: {}]  }
   0x1   :  { %v12_v0 = vld [vmem:[%s55_s1] sm:$0xff]  ;;  %v15_v1 = vstv %s54_s0  ;;  %v13_v2 = vld [vmem:[%s55_s1 + $0x8] sm:$0xff] }
   0x2   :  { %v16_v3 = vmin.f32 %v12_v0, %v15_v1  ;;  %v17_v4 = vmin.f32 %v13_v2, %v15_v1 }
   0x4   :  { %18 = vst [vmem:[%s56_s2] sm:$0xff] %v16_v3  ;;  %19 = vst [vmem:[%s56_s2 + $0x8] sm:$0xff] %v17_v4 }

</bundles_post_ra>
